<compile_context>
chip_gen: v7x
topology: tpu7x:2x2x1
jax: 0.10.0
libtpu: 0.0.40
codegen_flags: <defaults>
</compile_context>

<pallas_src>
import jax
import jax.numpy as jnp
from jax.experimental import pallas as pl
from jax.experimental.pallas import tpu as pltpu

LANE = 128  # vreg lane width


def _round_up(x, m):
    return ((x + m - 1) // m) * m


def mlp5_kernel(x_ref,
                w1_ref, b1_ref,
                w2_ref, b2_ref,
                w3_ref, b3_ref,
                w4_ref, b4_ref,
                w5_ref, b5_ref,
                o_ref):
    # All 5 layers fused.  f32 x -> bf16 cast on the VPU (idle slots in a
    # mem-bound kernel), bf16 MXU operands, f32 accumulation, bias + ReLU in
    # f32, re-cast to bf16 before the next dot and for the final store.
    h = x_ref[...].astype(jnp.bfloat16)  # [TB, in_dim] bf16

    def hidden_layer(h_bf16, w_ref, b_ref):
        acc = jnp.dot(h_bf16, w_ref[...], preferred_element_type=jnp.float32)
        acc = acc + b_ref[...]                    # (1, N) f32 bias broadcast
        return jnp.maximum(acc, 0.0).astype(jnp.bfloat16)

    h = hidden_layer(h, w1_ref, b1_ref)
    h = hidden_layer(h, w2_ref, b2_ref)
    h = hidden_layer(h, w3_ref, b3_ref)
    h = hidden_layer(h, w4_ref, b4_ref)

    acc = jnp.dot(h, w5_ref[...], preferred_element_type=jnp.float32)
    acc = acc + b5_ref[...]                       # no ReLU on the last layer
    o_ref[...] = acc.astype(o_ref.dtype)          # bf16 lane-dense store


def prepare_params(params):
    """One-time prep: pad hidden/output widths to 128 lanes, cast W to bf16.

    params: list of 5 (W, b), W: [in, out] f32 (transposed vs nn.Linear).
    Zero-padding is mathematically exact: padded activation columns hit zero
    weight rows in the next layer; padded output columns are sliced off in
    the wrapper.
    Returns (prepared_flat_list, meta).
    """
    input_dim = params[0][0].shape[0]
    output_dim = params[-1][0].shape[1]
    layer_dims = [(w.shape[0], w.shape[1]) for (w, _) in params]

    prepared = []
    prev_pad = input_dim  # input feature dim stays full-extent (no padding)
    for (w, b) in params:
        d_in, d_out = w.shape
        d_out_p = _round_up(d_out, LANE)
        w_p = jnp.zeros((prev_pad, d_out_p), jnp.float32).at[:d_in, :d_out].set(w)
        b_p = jnp.zeros((1, d_out_p), jnp.float32).at[0, :d_out].set(b)
        prepared += [w_p.astype(jnp.bfloat16), b_p]   # bf16 weights, f32 bias
        prev_pad = d_out_p

    meta = {
        "input_dim": input_dim,
        "output_dim": output_dim,
        "padded_output_dim": prev_pad,
        "layer_dims": layer_dims,
    }
    return prepared, meta


def _choose_tb(B, tb):
    """Pick the batch tile: big tiles to amortize per-step overhead, but
    split into >=2 grid steps when one tile would cover the whole batch so
    both v7x TensorCores get work (no-op on v5e/v6e)."""
    tb = max(8, _round_up(tb, 8))
    if B <= 8:
        return 8
    if _round_up(B, 8) <= tb:
        return max(8, _round_up(pl.cdiv(B, 2), 8))
    return tb


def mlp5_forward(x, prepared, meta, *, tb=1024):
    """x: [B, input_dim] float32. prepared/meta from prepare_params()."""
    B, in_dim = x.shape
    assert in_dim == meta["input_dim"]
    out_dim = meta["output_dim"]
    out_dim_p = meta["padded_output_dim"]

    tb = _choose_tb(B, tb)
    grid = (pl.cdiv(B, tb),)  # partial edge block OK: rows independent,
                              # out-of-range output writes are clipped.

    in_specs = [pl.BlockSpec((tb, in_dim), lambda i: (i, 0))]
    for arr in prepared:
        # constant index_map -> weights/biases stay VMEM-resident, no re-DMA
        in_specs.append(pl.BlockSpec(arr.shape, lambda i: (0, 0)))

    # Real (unpadded) cost numbers for XLA's scheduler.
    flops = 2 * B * sum(di * do for di, do in meta["layer_dims"])
    bytes_accessed = (
        B * in_dim * 4                                      # x (f32) read
        + sum(di * do * 2 + do * 4 for di, do in meta["layer_dims"])  # W bf16 + b f32
        + B * out_dim * 2)                                  # bf16 writeback

    out_p = pl.pallas_call(
        mlp5_kernel,
        out_shape=jax.ShapeDtypeStruct((B, out_dim_p), jnp.bfloat16),
        grid=grid,
        in_specs=in_specs,
        out_specs=pl.BlockSpec((tb, out_dim_p), lambda i: (i, 0)),
        compiler_params=pltpu.CompilerParams(
            dimension_semantics=("parallel",)),
        cost_estimate=pl.CostEstimate(
            flops=flops, transcendentals=0, bytes_accessed=bytes_accessed),
    )(x, *prepared)

    # Slice off the 128-lane padding and restore the f32 interface.
    return out_p[:B, :out_dim].astype(jnp.float32)


def init_params(key, input_dim, output_dim, hidden_dim=64):
    """Deterministic init mimicking nn.Linear's U(-1/sqrt(fan_in), +1/sqrt(fan_in))."""
    dims = [input_dim, hidden_dim, hidden_dim, hidden_dim, hidden_dim, output_dim]
    params = []
    for i in range(5):
        fan_in, fan_out = dims[i], dims[i + 1]
        key, kw, kb = jax.random.split(key, 3)
        bound = 1.0 / jnp.sqrt(fan_in)
        w = jax.random.uniform(kw, (fan_in, fan_out), jnp.float32, -bound, bound)
        b = jax.random.uniform(kb, (fan_out,), jnp.float32, -bound, bound)
        params.append((w, b))
    return params


def mlp5_reference(x, params):
    h = x
    for i, (w, b) in enumerate(params):
        h = h @ w + b
        if i < len(params) - 1:
            h = jnp.maximum(h, 0.0)
    return h


if __name__ == "__main__":
    B, input_dim, hidden_dim, output_dim = 8, 32, 64, 16

    key = jax.random.PRNGKey(0)
    key, kx = jax.random.split(key)
    x = jax.random.normal(kx, (B, input_dim), jnp.float32)
    params = init_params(key, input_dim, output_dim, hidden_dim)

    prepared, meta = prepare_params(params)   # one-time pad + bf16 cast
    out = mlp5_forward(x, prepared, meta)
    out = jax.block_until_ready(out)

    ref = mlp5_reference(x, params)
    assert out.shape == (B, output_dim)
    # bf16 operands / activations with f32 accumulation -> looser tolerance
    # vs the f32 reference (error compounds over 5 layers).
    assert jnp.allclose(out, ref, atol=5e-2, rtol=5e-2), (
        f"max abs err = {jnp.max(jnp.abs(out - ref))}")

    print("KERNEL_OK")
</pallas_src>

<mosaic_0001>
module attributes {stable_mosaic.version = 11 : i64} {
  func.func @mlp5_kernel(%arg0: i32, %arg1: memref<8x32xf32, #tpu.memory_space<vmem>>, %arg2: memref<32x128xbf16, #tpu.memory_space<vmem>>, %arg3: memref<1x128xf32, #tpu.memory_space<vmem>>, %arg4: memref<128x128xbf16, #tpu.memory_space<vmem>>, %arg5: memref<1x128xf32, #tpu.memory_space<vmem>>, %arg6: memref<128x128xbf16, #tpu.memory_space<vmem>>, %arg7: memref<1x128xf32, #tpu.memory_space<vmem>>, %arg8: memref<128x128xbf16, #tpu.memory_space<vmem>>, %arg9: memref<1x128xf32, #tpu.memory_space<vmem>>, %arg10: memref<128x128xbf16, #tpu.memory_space<vmem>>, %arg11: memref<1x128xf32, #tpu.memory_space<vmem>>, %arg12: memref<8x128xbf16, #tpu.memory_space<vmem>>) attributes {dimension_semantics = [#tpu.dimension_semantics<parallel>], iteration_bounds = array<i64: 1>, scalar_prefetch = 0 : i64, scratch_operands = 0 : i64, tpu.core_type = #tpu.core_type<tc>, window_params = [{transform_indices = @transform_0, window_bounds = array<i64: 8, 32>}, {pipeline_mode = #tpu.pipeline_mode<synchronous>, transform_indices = @transform_1, window_bounds = array<i64: 32, 128>}, {pipeline_mode = #tpu.pipeline_mode<synchronous>, transform_indices = @transform_2, window_bounds = array<i64: 1, 128>}, {pipeline_mode = #tpu.pipeline_mode<synchronous>, transform_indices = @transform_3, window_bounds = array<i64: 128, 128>}, {pipeline_mode = #tpu.pipeline_mode<synchronous>, transform_indices = @transform_4, window_bounds = array<i64: 1, 128>}, {pipeline_mode = #tpu.pipeline_mode<synchronous>, transform_indices = @transform_5, window_bounds = array<i64: 128, 128>}, {pipeline_mode = #tpu.pipeline_mode<synchronous>, transform_indices = @transform_6, window_bounds = array<i64: 1, 128>}, {pipeline_mode = #tpu.pipeline_mode<synchronous>, transform_indices = @transform_7, window_bounds = array<i64: 128, 128>}, {pipeline_mode = #tpu.pipeline_mode<synchronous>, transform_indices = @transform_8, window_bounds = array<i64: 1, 128>}, {pipeline_mode = #tpu.pipeline_mode<synchronous>, transform_indices = @transform_9, window_bounds = array<i64: 128, 128>}, {pipeline_mode = #tpu.pipeline_mode<synchronous>, transform_indices = @transform_10, window_bounds = array<i64: 1, 128>}, {transform_indices = @transform_11, window_bounds = array<i64: 8, 128>}]} {
    %c0 = arith.constant 0 : index
    %c0_0 = arith.constant 0 : index
    %0 = vector.load %arg1[%c0, %c0_0] : memref<8x32xf32, #tpu.memory_space<vmem>>, vector<8x32xf32>
    %1 = arith.truncf %0 : vector<8x32xf32> to vector<8x32xbf16>
    %c0_1 = arith.constant 0 : index
    %c0_2 = arith.constant 0 : index
    %2 = vector.load %arg2[%c0_1, %c0_2] : memref<32x128xbf16, #tpu.memory_space<vmem>>, vector<32x128xbf16>
    %cst = arith.constant dense<0.000000e+00> : vector<8x128xf32>
    %3 = tpu.matmul %1, %2, %cst {dimension_numbers = #tpu.dot_dimension_numbers<[1], [0], [0], [1], [0, 0, 1, 1], [], []>} : vector<8x32xbf16>, vector<32x128xbf16>, vector<8x128xf32> -> vector<8x128xf32>
    %c0_3 = arith.constant 0 : index
    %c0_4 = arith.constant 0 : index
    %4 = vector.load %arg3[%c0_3, %c0_4] : memref<1x128xf32, #tpu.memory_space<vmem>>, vector<1x128xf32>
    %5 = vector.broadcast %4 : vector<1x128xf32> to vector<8x128xf32>
    %6 = arith.addf %3, %5 : vector<8x128xf32>
    %cst_5 = arith.constant 0.000000e+00 : f32
    %7 = vector.broadcast %cst_5 : f32 to vector<8x128xf32>
    %8 = arith.maximumf %6, %7 : vector<8x128xf32>
    %9 = arith.truncf %8 : vector<8x128xf32> to vector<8x128xbf16>
    %c0_6 = arith.constant 0 : index
    %c0_7 = arith.constant 0 : index
    %10 = vector.load %arg4[%c0_6, %c0_7] : memref<128x128xbf16, #tpu.memory_space<vmem>>, vector<128x128xbf16>
    %cst_8 = arith.constant dense<0.000000e+00> : vector<8x128xf32>
    %11 = tpu.matmul %9, %10, %cst_8 {dimension_numbers = #tpu.dot_dimension_numbers<[1], [0], [0], [1], [0, 0, 1, 1], [], []>} : vector<8x128xbf16>, vector<128x128xbf16>, vector<8x128xf32> -> vector<8x128xf32>
    %c0_9 = arith.constant 0 : index
    %c0_10 = arith.constant 0 : index
    %12 = vector.load %arg5[%c0_9, %c0_10] : memref<1x128xf32, #tpu.memory_space<vmem>>, vector<1x128xf32>
    %13 = vector.broadcast %12 : vector<1x128xf32> to vector<8x128xf32>
    %14 = arith.addf %11, %13 : vector<8x128xf32>
    %cst_11 = arith.constant 0.000000e+00 : f32
    %15 = vector.broadcast %cst_11 : f32 to vector<8x128xf32>
    %16 = arith.maximumf %14, %15 : vector<8x128xf32>
    %17 = arith.truncf %16 : vector<8x128xf32> to vector<8x128xbf16>
    %c0_12 = arith.constant 0 : index
    %c0_13 = arith.constant 0 : index
    %18 = vector.load %arg6[%c0_12, %c0_13] : memref<128x128xbf16, #tpu.memory_space<vmem>>, vector<128x128xbf16>
    %cst_14 = arith.constant dense<0.000000e+00> : vector<8x128xf32>
    %19 = tpu.matmul %17, %18, %cst_14 {dimension_numbers = #tpu.dot_dimension_numbers<[1], [0], [0], [1], [0, 0, 1, 1], [], []>} : vector<8x128xbf16>, vector<128x128xbf16>, vector<8x128xf32> -> vector<8x128xf32>
    %c0_15 = arith.constant 0 : index
    %c0_16 = arith.constant 0 : index
    %20 = vector.load %arg7[%c0_15, %c0_16] : memref<1x128xf32, #tpu.memory_space<vmem>>, vector<1x128xf32>
    %21 = vector.broadcast %20 : vector<1x128xf32> to vector<8x128xf32>
    %22 = arith.addf %19, %21 : vector<8x128xf32>
    %cst_17 = arith.constant 0.000000e+00 : f32
    %23 = vector.broadcast %cst_17 : f32 to vector<8x128xf32>
    %24 = arith.maximumf %22, %23 : vector<8x128xf32>
    %25 = arith.truncf %24 : vector<8x128xf32> to vector<8x128xbf16>
    %c0_18 = arith.constant 0 : index
    %c0_19 = arith.constant 0 : index
    %26 = vector.load %arg8[%c0_18, %c0_19] : memref<128x128xbf16, #tpu.memory_space<vmem>>, vector<128x128xbf16>
    %cst_20 = arith.constant dense<0.000000e+00> : vector<8x128xf32>
    %27 = tpu.matmul %25, %26, %cst_20 {dimension_numbers = #tpu.dot_dimension_numbers<[1], [0], [0], [1], [0, 0, 1, 1], [], []>} : vector<8x128xbf16>, vector<128x128xbf16>, vector<8x128xf32> -> vector<8x128xf32>
    %c0_21 = arith.constant 0 : index
    %c0_22 = arith.constant 0 : index
    %28 = vector.load %arg9[%c0_21, %c0_22] : memref<1x128xf32, #tpu.memory_space<vmem>>, vector<1x128xf32>
    %29 = vector.broadcast %28 : vector<1x128xf32> to vector<8x128xf32>
    %30 = arith.addf %27, %29 : vector<8x128xf32>
    %cst_23 = arith.constant 0.000000e+00 : f32
    %31 = vector.broadcast %cst_23 : f32 to vector<8x128xf32>
    %32 = arith.maximumf %30, %31 : vector<8x128xf32>
    %33 = arith.truncf %32 : vector<8x128xf32> to vector<8x128xbf16>
    %c0_24 = arith.constant 0 : index
    %c0_25 = arith.constant 0 : index
    %34 = vector.load %arg10[%c0_24, %c0_25] : memref<128x128xbf16, #tpu.memory_space<vmem>>, vector<128x128xbf16>
    %cst_26 = arith.constant dense<0.000000e+00> : vector<8x128xf32>
    %35 = tpu.matmul %33, %34, %cst_26 {dimension_numbers = #tpu.dot_dimension_numbers<[1], [0], [0], [1], [0, 0, 1, 1], [], []>} : vector<8x128xbf16>, vector<128x128xbf16>, vector<8x128xf32> -> vector<8x128xf32>
    %c0_27 = arith.constant 0 : index
    %c0_28 = arith.constant 0 : index
    %36 = vector.load %arg11[%c0_27, %c0_28] : memref<1x128xf32, #tpu.memory_space<vmem>>, vector<1x128xf32>
    %37 = vector.broadcast %36 : vector<1x128xf32> to vector<8x128xf32>
    %38 = arith.addf %35, %37 : vector<8x128xf32>
    %39 = arith.truncf %38 : vector<8x128xf32> to vector<8x128xbf16>
    %c0_29 = arith.constant 0 : index
    %c0_30 = arith.constant 0 : index
    %40 = vector.load %arg12[%c0_29, %c0_30] : memref<8x128xbf16, #tpu.memory_space<vmem>>, vector<8x128xbf16>
    tpu.vector_store %arg12[%c0_29, %c0_30], %39 {strides = array<i32>} : memref<8x128xbf16, #tpu.memory_space<vmem>>, vector<8x128xbf16>,
    return
  }
  func.func @transform_0(%arg0: i32) -> (i32, i32) {
    %c0_i32 = arith.constant 0 : i32
    %c0_i32_0 = arith.constant 0 : i32
    return %arg0, %c0_i32 : i32, i32
  }
  func.func @transform_1(%arg0: i32) -> (i32, i32) {
    %c0_i32 = arith.constant 0 : i32
    %c0_i32_0 = arith.constant 0 : i32
    %c0_i32_1 = arith.constant 0 : i32
    return %c0_i32, %c0_i32_0 : i32, i32
  }
  func.func @transform_2(%arg0: i32) -> (i32, i32) {
    %c0_i32 = arith.constant 0 : i32
    %c0_i32_0 = arith.constant 0 : i32
    %c0_i32_1 = arith.constant 0 : i32
    return %c0_i32, %c0_i32_0 : i32, i32
  }
  func.func @transform_3(%arg0: i32) -> (i32, i32) {
    %c0_i32 = arith.constant 0 : i32
    %c0_i32_0 = arith.constant 0 : i32
    %c0_i32_1 = arith.constant 0 : i32
    return %c0_i32, %c0_i32_0 : i32, i32
  }
  func.func @transform_4(%arg0: i32) -> (i32, i32) {
    %c0_i32 = arith.constant 0 : i32
    %c0_i32_0 = arith.constant 0 : i32
    %c0_i32_1 = arith.constant 0 : i32
    return %c0_i32, %c0_i32_0 : i32, i32
  }
  func.func @transform_5(%arg0: i32) -> (i32, i32) {
    %c0_i32 = arith.constant 0 : i32
    %c0_i32_0 = arith.constant 0 : i32
    %c0_i32_1 = arith.constant 0 : i32
    return %c0_i32, %c0_i32_0 : i32, i32
  }
  func.func @transform_6(%arg0: i32) -> (i32, i32) {
    %c0_i32 = arith.constant 0 : i32
    %c0_i32_0 = arith.constant 0 : i32
    %c0_i32_1 = arith.constant 0 : i32
    return %c0_i32, %c0_i32_0 : i32, i32
  }
  func.func @transform_7(%arg0: i32) -> (i32, i32) {
    %c0_i32 = arith.constant 0 : i32
    %c0_i32_0 = arith.constant 0 : i32
    %c0_i32_1 = arith.constant 0 : i32
    return %c0_i32, %c0_i32_0 : i32, i32
  }
  func.func @transform_8(%arg0: i32) -> (i32, i32) {
    %c0_i32 = arith.constant 0 : i32
    %c0_i32_0 = arith.constant 0 : i32
    %c0_i32_1 = arith.constant 0 : i32
    return %c0_i32, %c0_i32_0 : i32, i32
  }
  func.func @transform_9(%arg0: i32) -> (i32, i32) {
    %c0_i32 = arith.constant 0 : i32
    %c0_i32_0 = arith.constant 0 : i32
    %c0_i32_1 = arith.constant 0 : i32
    return %c0_i32, %c0_i32_0 : i32, i32
  }
  func.func @transform_10(%arg0: i32) -> (i32, i32) {
    %c0_i32 = arith.constant 0 : i32
    %c0_i32_0 = arith.constant 0 : i32
    %c0_i32_1 = arith.constant 0 : i32
    return %c0_i32, %c0_i32_0 : i32, i32
  }
  func.func @transform_11(%arg0: i32) -> (i32, i32) {
    %c0_i32 = arith.constant 0 : i32
    %c0_i32_0 = arith.constant 0 : i32
    return %arg0, %c0_i32 : i32, i32
  }
}

</mosaic_0001>

<bundles_post_ra>
// kernel: tpu_custom_call.1
= control target key start
LH: loop header
LB: loop body
LE: loop exit
PB: predicated region body
PF: predicated region fallthrough
CT: control target
= control target key end

     0   :  { %16 = vsyncpa [#allocation3], 0  ;;  %s1266_s0 = inlined_call_operand.hbm [shape: f32[8,32], index: 0, kind: input, shape index: {}]   ;;  %s1267_s1 = inlined_call_operand.hbm [shape: bf16[32,128], index: 1, kind: input, shape index: {}]   ;;  %s1268_s2 = inlined_call_operand.vmem [shape: f32[1,128], index: 2, kind: input, shape index: {}]   ;;  %s1269_s3 = inlined_call_operand.hbm [shape: bf16[128,128], index: 3, kind: input, shape index: {}]   ;;  %s1270_s4 = inlined_call_operand.vmem [shape: f32[1,128], index: 4, kind: input, shape index: {}]   ;;  %s1271_s5 = inlined_call_operand.hbm [shape: bf16[128,128], index: 5, kind: input, shape index: {}]   ;;  %s1272_s6 = inlined_call_operand.vmem [shape: f32[1,128], index: 6, kind: input, shape index: {}]   ;;  %s1273_s7 = inlined_call_operand.hbm [shape: bf16[128,128], index: 7, kind: input, shape index: {}]   ;;  %s1274_s8 = inlined_call_operand.vmem [shape: f32[1,128], index: 8, kind: input, shape index: {}]   ;;  %s1275_s9 = inlined_call_operand.hbm [shape: bf16[128,128], index: 9, kind: input, shape index: {}]   ;;  %s1276_s10 = inlined_call_operand.vmem [shape: f32[1,128], index: 10, kind: input, shape index: {}]   ;;  %s1277_s11 = inlined_call_operand.hbm [shape: bf16[8,128], index: 11, kind: output, shape index: {}]  }
   0x1   :  { %17 = vsyncpa [#allocation6], 0 }
   0x2   :  { %18 = vsyncpa [#allocation9], 0 }
   0x3   :  { %19 = vsyncpa [#allocation12], 0 }
   0x4   :  { %20 = vsyncpa [#allocation4], 0  ;;  %s1037_s17 = smov [#allocation5]   ;;  %s873_s21 = scalar_lea.hbm %s1267_s1, 256 }
   0x5   :  { %s36_s18 = sshll.u32 %s1037_s17, 4  ;;  %p874_p0 = scmp.ne.s32.totalorder %s1267_s1, %s873_s21  ;;  %s37_s18 = int_to_ptr.vmem [resolvable:$true] %s36_s18 }
   0x6   :  { %p877_p1 = scmp.lt.u32.totalorder %s873_s21, %s1267_s1 }
   0x8   :  { %p879_p2 = pnand %p877_p1, %p874_p0 }
   0xa   :  { %882 = shalt.err (!%p879_p2)
}
   0xb   :  { %s883_s26 = scalar_lea.vmem %s37_s18, 256  ;;  %p888_p4 = scmp.lt.s32.totalorder %s37_s18, %s37_s18 }
   0xc   :  { %p884_p3 = scmp.ne.s32.totalorder %s37_s18, %s883_s26  ;;  %p889_p5 = scmp.lt.s32.totalorder %s883_s26, %s883_s26 }
   0xe   :  { %p890_p6 = por %p889_p5, %p888_p4 }
  0x10   :  { %p891_p7 = pnand %p890_p6, %p884_p3 }
  0x12   :  { %894 = shalt.err (!%p891_p7)
}
  0x13   :  { %s1038_s27 = smov 64   ;;  %s1039_s28 = smov 4  }
  0x14   :  { %42 = dma.hbm_to_vmem [thread:$0]  %s1267_s1, 256, %s37_s18, [#allocation6], %s1038_s27, %s1038_s27, %s1039_s28  }
  0x15   :  { %s1040_s12 = smov [#allocation8]   ;;  %s1041_s14 = smov [#allocation2]  }
  0x16   :  { %s64_s13 = sshll.u32 %s1040_s12, 4  ;;  %s27_s15 = sshll.u32 %s1041_s14, 4  ;;  %s65_s13 = int_to_ptr.vmem [resolvable:$true] %s64_s13  ;;  %s28_s15 = int_to_ptr.vmem [resolvable:$true] %s27_s15 }
  0x17   :  { %s895_s19 = scalar_lea.hbm %s1271_s5, 1024 }
  0x18   :  { %p896_p8 = scmp.ne.s32.totalorder %s1271_s5, %s895_s19  ;;  %p899_p9 = scmp.lt.u32.totalorder %s895_s19, %s1271_s5 }
  0x1a   :  { %p901_p10 = pnand %p899_p9, %p896_p8 }
  0x1c   :  { %904 = shalt.err (!%p901_p10)
}
  0x1d   :  { %s905_s1 = scalar_lea.vmem %s65_s13, 1024  ;;  %p910_p12 = scmp.lt.s32.totalorder %s65_s13, %s65_s13 }
  0x1e   :  { %p906_p11 = scmp.ne.s32.totalorder %s65_s13, %s905_s1  ;;  %p911_p13 = scmp.lt.s32.totalorder %s905_s1, %s905_s1 }
  0x20   :  { %p912_p0 = por %p911_p13, %p910_p12 }
  0x22   :  { %p913_p1 = pnand %p912_p0, %p906_p11 }
  0x24   :  { %916 = shalt.err (!%p913_p1)
}
  0x25   :  { %70 = dma.hbm_to_vmem [thread:$0]  %s1271_s5, 1024, %s65_s13, [#allocation9], %s1038_s27, %s1038_s27, %s1039_s28  }
  0x26   :  { %s917_s29 = scalar_lea.hbm %s1266_s0, 128 }
  0x27   :  { %p918_p2 = scmp.ne.s32.totalorder %s1266_s0, %s917_s29  ;;  %p921_p3 = scmp.lt.u32.totalorder %s917_s29, %s1266_s0 }
  0x29   :  { %p923_p4 = pnand %p921_p3, %p918_p2 }
  0x2b   :  { %926 = shalt.err (!%p923_p4)
}
  0x2c   :  { %s927_s17 = scalar_lea.vmem %s28_s15, 128  ;;  %p932_p6 = scmp.lt.s32.totalorder %s28_s15, %s28_s15 }
  0x2d   :  { %p928_p5 = scmp.ne.s32.totalorder %s28_s15, %s927_s17  ;;  %p933_p7 = scmp.lt.s32.totalorder %s927_s17, %s927_s17 }
  0x2f   :  { %p934_p8 = por %p933_p7, %p932_p6 }
  0x31   :  { %p935_p9 = pnand %p934_p8, %p928_p5 }
  0x33   :  { %938 = shalt.err (!%p935_p9)
}
  0x34   :  { %30 = dma.hbm_to_vmem [thread:$0]  %s1266_s0, 128, %s28_s15, [#allocation3]  }
  0x35   :  { %s1042_s19 = smov [#allocation7]   ;;  %s1043_s21 = smov [#allocation10]  }
  0x36   :  { %s50_s20 = sshll.u32 %s1042_s19, 4  ;;  %s78_s22 = sshll.u32 %s1043_s21, 4  ;;  %s51_s20 = int_to_ptr.vmem [resolvable:$true] %s50_s20  ;;  %s79_s22 = int_to_ptr.vmem [resolvable:$true] %s78_s22 }
  0x37   :  { %s939_s18 = scalar_lea.hbm %s1269_s3, 1024 }
  0x38   :  { %p940_p10 = scmp.ne.s32.totalorder %s1269_s3, %s939_s18  ;;  %p943_p11 = scmp.lt.u32.totalorder %s939_s18, %s1269_s3 }
  0x3a   :  { %p945_p12 = pnand %p943_p11, %p940_p10 }
  0x3c   :  { %948 = shalt.err (!%p945_p12)
}
  0x3d   :  { %s949_s0 = scalar_lea.vmem %s51_s20, 1024  ;;  %p954_p0 = scmp.lt.s32.totalorder %s51_s20, %s51_s20 }
  0x3e   :  { %p950_p13 = scmp.ne.s32.totalorder %s51_s20, %s949_s0  ;;  %p955_p1 = scmp.lt.s32.totalorder %s949_s0, %s949_s0 }
  0x40   :  { %p956_p2 = por %p955_p1, %p954_p0 }
  0x42   :  { %p957_p3 = pnand %p956_p2, %p950_p13 }
  0x44   :  { %960 = shalt.err (!%p957_p3)
}
  0x45   :  { %56 = dma.hbm_to_vmem [thread:$0]  %s1269_s3, 1024, %s51_s20, [#allocation6], %s1038_s27, %s1038_s27, %s1039_s28  }
  0x46   :  { %s961_s16 = scalar_lea.hbm %s1273_s7, 1024 }
  0x47   :  { %p962_p4 = scmp.ne.s32.totalorder %s1273_s7, %s961_s16  ;;  %p965_p5 = scmp.lt.u32.totalorder %s961_s16, %s1273_s7 }
  0x49   :  { %p967_p6 = pnand %p965_p5, %p962_p4 }
  0x4b   :  { %970 = shalt.err (!%p967_p6)
}
  0x4c   :  { %s971_s21 = scalar_lea.vmem %s79_s22, 1024  ;;  %p976_p8 = scmp.lt.s32.totalorder %s79_s22, %s79_s22 }
  0x4d   :  { %p972_p7 = scmp.ne.s32.totalorder %s79_s22, %s971_s21  ;;  %p977_p9 = scmp.lt.s32.totalorder %s971_s21, %s971_s21 }
  0x4f   :  { %p978_p10 = por %p977_p9, %p976_p8 }
  0x51   :  { %p979_p11 = pnand %p978_p10, %p972_p7 }
  0x53   :  { %982 = shalt.err (!%p979_p11)
}
  0x54   :  { %84 = dma.hbm_to_vmem [thread:$0]  %s1273_s7, 1024, %s79_s22, [#allocation9], %s1038_s27, %s1038_s27, %s1039_s28  }
  0x55   :  { %s1044_s23 = smov [#allocation11]   ;;  %s983_s25 = scalar_lea.hbm %s1275_s9, 1024 }
  0x56   :  { %s92_s1 = sshll.u32 %s1044_s23, 4  ;;  %p984_p12 = scmp.ne.s32.totalorder %s1275_s9, %s983_s25  ;;  %s93_s1 = int_to_ptr.vmem [resolvable:$true] %s92_s1 }
  0x57   :  { %p987_p13 = scmp.lt.u32.totalorder %s983_s25, %s1275_s9 }
  0x59   :  { %p989_p0 = pnand %p987_p13, %p984_p12 }
  0x5b   :  { %992 = shalt.err (!%p989_p0)
}
  0x5c   :  { %s993_s30 = scalar_lea.vmem %s93_s1, 1024  ;;  %p998_p2 = scmp.lt.s32.totalorder %s93_s1, %s93_s1 }
  0x5d   :  { %p994_p1 = scmp.ne.s32.totalorder %s93_s1, %s993_s30  ;;  %p999_p3 = scmp.lt.s32.totalorder %s993_s30, %s993_s30 }
  0x5f   :  { %p1000_p4 = por %p999_p3, %p998_p2 }
  0x61   :  { %p1001_p5 = pnand %p1000_p4, %p994_p1 }
  0x63   :  { %1004 = shalt.err (!%p1001_p5)
}
  0x64   :  { %98 = dma.hbm_to_vmem [thread:$0]  %s1275_s9, 1024, %s93_s1, [#allocation12], %s1038_s27, %s1038_s27, %s1039_s28  }
  0x65   :  { %1027 = dma.done.wait [#allocation3], 128  }
  0x66   :  { %1028 = vsyncadd [#allocation3], 4294967168 }
  0x67   :  { %1029 = dma.done.wait [#allocation6], 1280  }
  0x68   :  { %1030 = vsyncadd [#allocation6], 4294966016 }
  0x69   :  { %1031 = dma.done.wait [#allocation9], 2048  }
  0x6a   :  { %1032 = vsyncadd [#allocation9], 4294965248 }
  0x6b   :  { %1033 = dma.done.wait [#allocation12], 1024  }
  0x6c   :  { %1034 = vsyncadd [#allocation12], 4294966272  ;;  %v1045_v0 = vmov 0.0   ;;  %vm1046_vm0 = vmmov 0   ;;  %v839_v1 = vld [vmem:[#allocation5] sm:$0xff]   ;;  %v840_v2 = vld [vmem:[#allocation5 + $0x8] sm:$0xff]  }
  0x6d   :  { %740 = vmatprep.subr.bf16.mxu0 %v1045_v0  ;;  %744 = vmatprep.mubr.msk.bf16.mxu0 %vm1046_vm0, %v1045_v0  ;;  %v120_v3 = vld [vmem:[#allocation2] sm:$0xff]  ;;  %v841_v4 = vld [vmem:[#allocation7] sm:$0xff]   ;;  %vm145_vm1 = vcmask 261120   ;;  %v843_v7 = vld [vmem:[#allocation7 + $0x10] sm:$0xff]   ;;  %s1047_s5 = smov [#allocation13]  }
  0x6e   :  { %748 = vmatprep.subr.bf16.mxu1 %v1045_v0  ;;  %764 = vmatprep.mubr.msk.bf16.mxu1 %vm1046_vm0, %v1045_v0  ;;  %v121_v5 = vpack.c.bf16 %v120_v3, %v120_v3  ;;  %v842_v6 = vld [vmem:[#allocation7 + $0x8] sm:$0xff]   ;;  %v844_v8 = vld [vmem:[#allocation7 + $0x18] sm:$0xff]   ;;  %v845_v9 = vld [vmem:[#allocation7 + $0x20] sm:$0xff]   ;;  %s649_s13 = sshll.u32 %s1047_s5, 4  ;;  %s650_s13 = int_to_ptr.vmem [resolvable:$true] %s649_s13 }
  0x6f   :  { %741 = vmatpush3.bf16.msra.mxu0 %v839_v1  ;;  %749 = vmatpush3.bf16.msra.mxu1 %v841_v4  ;;  %v846_v10 = vld [vmem:[#allocation7 + $0x28] sm:$0xff]   ;;  %v847_v11 = vld [vmem:[#allocation7 + $0x30] sm:$0xff]   ;;  %v848_v12 = vld [vmem:[#allocation7 + $0x38] sm:$0xff]   ;;  %p1010_p7 = scmp.lt.s32.totalorder %s650_s13, %s650_s13 }
  0x70   :  { %742 = vmatprep.subr.bf16.mxu0 %v1045_v0  ;;  %750 = vmatprep.subr.bf16.mxu1 %v1045_v0  ;;  %v849_v13 = vld [vmem:[#allocation8] sm:$0xff]   ;;  %v850_v14 = vld [vmem:[#allocation8 + $0x8] sm:$0xff]   ;;  %v851_v15 = vld [vmem:[#allocation8 + $0x10] sm:$0xff]  }
  0x71   :  { %v852_v16 = vld [vmem:[#allocation8 + $0x18] sm:$0xff]   ;;  %v853_v17 = vld [vmem:[#allocation8 + $0x20] sm:$0xff]   ;;  %v854_v18 = vld [vmem:[#allocation8 + $0x28] sm:$0xff]  }
  0x72   :  { %v661_v19 = vld [vmem:[%s1268_s2] ss:$0 sm:$0xff]  ;;  %v855_v27 = vld [vmem:[#allocation8 + $0x30] sm:$0xff]   ;;  %v856_v28 = vld [vmem:[#allocation8 + $0x38] sm:$0xff]  }
  0x73   :  { %743 = vmatpush3.bf16.msra.mxu0 %v840_v2  ;;  %751 = vmatpush3.bf16.msra.mxu1 %v842_v6  ;;  %v857_v29 = vld [vmem:[#allocation10] sm:$0xff]   ;;  %v858_v30 = vld [vmem:[#allocation10 + $0x8] sm:$0xff]   ;;  %v859_v31 = vld [vmem:[#allocation10 + $0x10] sm:$0xff]  }
  0x74   :  { %768 = vmatprep.subr.bf16.mxu0 %v1045_v0  ;;  %752 = vmatprep.subr.bf16.mxu1 %v1045_v0  ;;  %v860_v32 = vld [vmem:[#allocation10 + $0x18] sm:$0xff]   ;;  %v861_v33 = vld [vmem:[#allocation10 + $0x20] sm:$0xff]   ;;  %v862_v34 = vld [vmem:[#allocation10 + $0x28] sm:$0xff]  }
  0x75   :  { %v665_v35 = vld [vmem:[%s1270_s4] ss:$0 sm:$0xff]  ;;  %v863_v43 = vld [vmem:[#allocation10 + $0x30] sm:$0xff]   ;;  %v864_v44 = vld [vmem:[#allocation10 + $0x38] sm:$0xff]  }
  0x76   :  { %745 = vmatmul.mubr.msk.bf16.vlgmr.msra.gmra.mrb[0].mxu0 %vm145_vm1, %v121_v5  ;;  %v865_v45 = vld [vmem:[#allocation11] sm:$0xff]   ;;  %v866_v46 = vld [vmem:[#allocation11 + $0x8] sm:$0xff]   ;;  %v867_v47 = vld [vmem:[#allocation11 + $0x10] sm:$0xff]  }
  0x77   :  { %784 = vmatprep.mubr.msk.bf16.mxu0 %vm1046_vm0, %v1045_v0  ;;  %753 = vmatpush3.bf16.msra.mxu1 %v843_v7  ;;  %v868_v48 = vld [vmem:[#allocation11 + $0x18] sm:$0xff]   ;;  %v869_v49 = vld [vmem:[#allocation11 + $0x20] sm:$0xff]   ;;  %v870_v50 = vld [vmem:[#allocation11 + $0x28] sm:$0xff]  }
  0x78   :  { %754 = vmatprep.subr.bf16.mxu1 %v1045_v0  ;;  %769 = vmatpush3.bf16.msra.mxu0 %v849_v13  ;;  %v674_v51 = vld [vmem:[%s1272_s6] ss:$0 sm:$0xff]  ;;  %v871_v59 = vld [vmem:[#allocation11 + $0x30] sm:$0xff]   ;;  %v872_v60 = vld [vmem:[#allocation11 + $0x38] sm:$0xff]  }
  0x79   :  { %770 = vmatprep.subr.bf16.mxu0 %v1045_v0  ;;  %v683_v61 = vld [vmem:[%s1274_s8] ss:$0 sm:$0xff]  ;;  %s1005_s8 = scalar_lea.vmem %s650_s13, 64 }
  0x7a   :  { %v692_v6 = vld [vmem:[%s1276_s10] ss:$0 sm:$0xff]  ;;  %p1006_p6 = scmp.ne.s32.totalorder %s650_s13, %s1005_s8  ;;  %p1011_p8 = scmp.lt.s32.totalorder %s1005_s8, %s1005_s8 }
  0x7b   :  { %755 = vmatpush3.bf16.msra.mxu1 %v844_v8 }
  0x7c   :  { %756 = vmatprep.subr.bf16.mxu1 %v1045_v0  ;;  %771 = vmatpush3.bf16.msra.mxu0 %v850_v14  ;;  %p1012_p9 = por %p1011_p8, %p1010_p7 }
  0x7d   :  { %772 = vmatprep.subr.bf16.mxu0 %v1045_v0 }
  0x7e   :  { %p1013_p10 = pnand %p1012_p9, %p1006_p6 }
  0x7f   :  { %757 = vmatpush3.bf16.msra.mxu1 %v845_v9 }
  0x80   :  { %758 = vmatprep.subr.bf16.mxu1 %v1045_v0  ;;  %773 = vmatpush3.bf16.msra.mxu0 %v851_v15 }
  0x81   :  { %774 = vmatprep.subr.bf16.mxu0 %v1045_v0 }
  0x83   :  { %759 = vmatpush3.bf16.msra.mxu1 %v846_v10 }
  0x84   :  { %760 = vmatprep.subr.bf16.mxu1 %v1045_v0  ;;  %775 = vmatpush3.bf16.msra.mxu0 %v852_v16 }
  0x85   :  { %776 = vmatprep.subr.bf16.mxu0 %v1045_v0 }
  0x87   :  { %761 = vmatpush3.bf16.msra.mxu1 %v847_v11 }
  0x88   :  { %762 = vmatprep.subr.bf16.mxu1 %v1045_v0  ;;  %777 = vmatpush3.bf16.msra.mxu0 %v853_v17 }
  0x89   :  { %778 = vmatprep.subr.bf16.mxu0 %v1045_v0 }
  0x8b   :  { %763 = vmatpush3.bf16.msra.mxu1 %v848_v12 }
  0x8c   :  { %788 = vmatprep.subr.bf16.mxu1 %v1045_v0  ;;  %779 = vmatpush3.bf16.msra.mxu0 %v854_v18 }
  0x8d   :  { %780 = vmatprep.subr.bf16.mxu0 %v1045_v0 }
  0x90   :  { %781 = vmatpush3.bf16.msra.mxu0 %v855_v27 }
  0x91   :  { %782 = vmatprep.subr.bf16.mxu0 %v1045_v0 }
  0x94   :  { %783 = vmatpush3.bf16.msra.mxu0 %v856_v28 }
  0x95   :  { %808 = vmatprep.subr.bf16.mxu0 %v1045_v0 }
 0x149   :  { %v183_v20 = vpop.f32.mrb[0].mxu0 }
 0x14a   :  { %v184_v21 = vadd.f32 %v661_v19, %v183_v20  ;;  %v746_v22 = vpop.f32.mrb[1].mxu0 }
 0x14b   :  { %v186_v23 = vpop.f32.mrb[2].mxu0 }
 0x14c   :  { %v189_v24 = vmax.f32 %v184_v21, 0.0  ;;  %v747_v25 = vpop.f32.mrb[3].mxu0 }
 0x14e   :  { %v190_v26 = vpack.c.bf16 %v189_v24, %v189_v24 }
 0x150   :  { %765 = vmatmul.mubr.bf16.vlgmr.msra.gmra.mrb[0].mxu1 %v190_v26 }
 0x151   :  { %804 = vmatprep.mubr.msk.bf16.mxu1 %vm1046_vm0, %v1045_v0  ;;  %789 = vmatpush3.bf16.msra.mxu1 %v857_v29 }
 0x152   :  { %790 = vmatprep.subr.bf16.mxu1 %v1045_v0 }
 0x155   :  { %791 = vmatpush3.bf16.msra.mxu1 %v858_v30 }
 0x156   :  { %792 = vmatprep.subr.bf16.mxu1 %v1045_v0 }
 0x159   :  { %793 = vmatpush3.bf16.msra.mxu1 %v859_v31 }
 0x15a   :  { %794 = vmatprep.subr.bf16.mxu1 %v1045_v0 }
 0x15d   :  { %795 = vmatpush3.bf16.msra.mxu1 %v860_v32 }
 0x15e   :  { %796 = vmatprep.subr.bf16.mxu1 %v1045_v0 }
 0x161   :  { %797 = vmatpush3.bf16.msra.mxu1 %v861_v33 }
 0x162   :  { %798 = vmatprep.subr.bf16.mxu1 %v1045_v0 }
 0x165   :  { %799 = vmatpush3.bf16.msra.mxu1 %v862_v34 }
 0x166   :  { %800 = vmatprep.subr.bf16.mxu1 %v1045_v0 }
 0x169   :  { %801 = vmatpush3.bf16.msra.mxu1 %v863_v43 }
 0x16a   :  { %802 = vmatprep.subr.bf16.mxu1 %v1045_v0 }
 0x16d   :  { %803 = vmatpush3.bf16.msra.mxu1 %v864_v44 }
 0x223   :  { %v296_v36 = vpop.f32.mrb[0].mxu1 }
 0x224   :  { %v297_v37 = vadd.f32 %v665_v35, %v296_v36  ;;  %v766_v38 = vpop.f32.mrb[1].mxu1 }
 0x225   :  { %v299_v39 = vpop.f32.mrb[2].mxu1 }
 0x226   :  { %v302_v40 = vmax.f32 %v297_v37, 0.0  ;;  %v767_v41 = vpop.f32.mrb[3].mxu1 }
 0x228   :  { %v303_v42 = vpack.c.bf16 %v302_v40, %v302_v40 }
 0x22a   :  { %785 = vmatmul.mubr.bf16.vlgmr.msra.gmra.mrb[4].mxu0 %v303_v42 }
 0x22b   :  { %824 = vmatprep.mubr.msk.bf16.mxu0 %vm1046_vm0, %v1045_v0  ;;  %809 = vmatpush3.bf16.msra.mxu0 %v865_v45 }
 0x22c   :  { %810 = vmatprep.subr.bf16.mxu0 %v1045_v0 }
 0x22f   :  { %811 = vmatpush3.bf16.msra.mxu0 %v866_v46 }
 0x230   :  { %812 = vmatprep.subr.bf16.mxu0 %v1045_v0 }
 0x233   :  { %813 = vmatpush3.bf16.msra.mxu0 %v867_v47 }
 0x234   :  { %814 = vmatprep.subr.bf16.mxu0 %v1045_v0 }
 0x237   :  { %815 = vmatpush3.bf16.msra.mxu0 %v868_v48 }
 0x238   :  { %816 = vmatprep.subr.bf16.mxu0 %v1045_v0 }
 0x23b   :  { %817 = vmatpush3.bf16.msra.mxu0 %v869_v49 }
 0x23c   :  { %818 = vmatprep.subr.bf16.mxu0 %v1045_v0 }
 0x23f   :  { %819 = vmatpush3.bf16.msra.mxu0 %v870_v50 }
 0x240   :  { %820 = vmatprep.subr.bf16.mxu0 %v1045_v0 }
 0x243   :  { %821 = vmatpush3.bf16.msra.mxu0 %v871_v59 }
 0x244   :  { %822 = vmatprep.subr.bf16.mxu0 %v1045_v0 }
 0x247   :  { %823 = vmatpush3.bf16.msra.mxu0 %v872_v60 }
 0x2fd   :  { %v409_v52 = vpop.f32.mrb[4].mxu0 }
 0x2fe   :  { %v410_v53 = vadd.f32 %v674_v51, %v409_v52  ;;  %v786_v54 = vpop.f32.mrb[5].mxu0 }
 0x2ff   :  { %v412_v55 = vpop.f32.mrb[6].mxu0 }
 0x300   :  { %v415_v56 = vmax.f32 %v410_v53, 0.0  ;;  %v787_v57 = vpop.f32.mrb[7].mxu0 }
 0x302   :  { %v416_v58 = vpack.c.bf16 %v415_v56, %v415_v56 }
 0x304   :  { %805 = vmatmul.mubr.bf16.vlgmr.msra.gmra.mrb[4].mxu1 %v416_v58 }
 0x3d7   :  { %v522_v62 = vpop.f32.mrb[4].mxu1 }
 0x3d8   :  { %v523_v63 = vadd.f32 %v683_v61, %v522_v62  ;;  %v806_v1 = vpop.f32.mrb[5].mxu1 }
 0x3d9   :  { %v525_v2 = vpop.f32.mrb[6].mxu1 }
 0x3da   :  { %v528_v3 = vmax.f32 %v523_v63, 0.0  ;;  %v807_v4 = vpop.f32.mrb[7].mxu1 }
 0x3dc   :  { %v529_v5 = vpack.c.bf16 %v528_v3, %v528_v3 }
 0x3de   :  { %825 = vmatmul.mubr.bf16.vlgmr.msra.gmra.mrb[8].mxu0 %v529_v5 }
 0x4b1   :  { %v635_v7 = vpop.f32.mrb[8].mxu0 }
 0x4b2   :  { %v636_v0 = vadd.f32 %v692_v6, %v635_v7  ;;  %v826_v8 = vpop.f32.mrb[9].mxu0 }
 0x4b3   :  { %v638_v9 = vpop.f32.mrb[10].mxu0 }
 0x4b4   :  { %v641_v10 = vpack.c.bf16 %v636_v0, %v636_v0  ;;  %v827_v11 = vpop.f32.mrb[11].mxu0 }
 0x4b6   :  { %642 = vst [vmem:[#allocation13] sm:$0xf] %v641_v10 }
 0x4b7   :  { %1016 = shalt.err (!%p1013_p10)
}
 0x4b8   :  { %s1017_s10 = scalar_lea.hbm %s1277_s11, 64 }
 0x4b9   :  { %p1018_p11 = scmp.ne.s32.totalorder %s1277_s11, %s1017_s10  ;;  %p1021_p12 = scmp.lt.u32.totalorder %s1017_s10, %s1277_s11 }
 0x4bb   :  { %p1023_p13 = pnand %p1021_p12, %p1018_p11 }
 0x4bd   :  { %1026 = shalt.err (!%p1023_p13)
}
 0x4be   :  { %652 = dma.vmem_to_hbm [thread:$0]  %s650_s13, 64, %s1277_s11, [#allocation4]  }
 0x4bf   :  { %1035 = dma.done.wait [#allocation4], 64  }
 0x4c0   :  { %1036 = vsyncadd [#allocation4], 4294967232 }
 0x4c1   :  { %656 = vsyncpa [#allocation3], 1 }
 0x4c2   :  { %657 = vsyncpa [#allocation6], 1 }
 0x4c3   :  { %658 = vsyncpa [#allocation9], 1 }
 0x4c4   :  { %659 = vsyncpa [#allocation12], 1 }
 0x4c5   :  { %660 = vsyncpa [#allocation4], 1 }

</bundles_post_ra>
